<compile_context>
chip_gen: v7x
topology: tpu7x:2x2x1
jax: 0.10.0
libtpu: 0.0.40
codegen_flags: <defaults>
</compile_context>

<pallas_src>
import jax
import jax.numpy as jnp
from jax.experimental import pallas as pl
from jax.experimental.pallas import tpu as pltpu

# --- "Module" configuration (synthetic, HAR-like) -----------------------------
BATCH = 2
C, H, W = 4, 16, 16
NUM_INPUTS = C * H * W          # 1024
NUM_OUTPUTS = 6                 # e.g. 6 activity classes

LANE = 128                      # TPU lane width: pad output dim to a multiple


def _round_up(a, m):
    return ((a + m - 1) // m) * m


# --- Pallas kernel: fused flatten-matmul-bias hot path ------------------------
def linear_kernel(x_ref, w_ref, b_ref, o_ref):
    # x_ref: (TM, F) f32  -> bf16 cast in-register (no wrapper-side rewrite)
    # w_ref: (F, O_pad) bf16 (prepared once, VMEM-resident across grid steps)
    # b_ref: (1, O_pad) f32
    # o_ref: (TM, O_pad) bf16
    x_bf = x_ref[...].astype(jnp.bfloat16)
    acc = jnp.dot(x_bf, w_ref[...], preferred_element_type=jnp.float32)
    o_ref[...] = (acc + b_ref[...]).astype(o_ref.dtype)


def prepare_params(weight_t, bias):
    """One-time parameter prep, hoisted out of the per-call forward path."""
    F, O = weight_t.shape
    O_pad = _round_up(O, LANE)                          # lane-dense output dim
    w_bf = jnp.zeros((F, O_pad), jnp.bfloat16).at[:, :O].set(
        weight_t.astype(jnp.bfloat16))
    b_pad = jnp.zeros((1, O_pad), jnp.float32).at[0, :O].set(bias)
    return w_bf, b_pad, O


def net_forward(x_nchw, w_bf, b_pad, num_outputs, *, tm=2048):
    """x_nchw: (B, C, H, W) f32; w_bf: (F, O_pad) bf16; b_pad: (1, O_pad) f32."""
    B = x_nchw.shape[0]
    F, O_pad = w_bf.shape

    # Glue: flatten(start_dim=1) — pure reshape, stays in plain JAX.
    x2d = x_nchw.reshape(B, F)

    # Batch tile: multiple of 16 (bf16 sublane packing).  When the batch is
    # big enough, cap the tile so the grid has >=2 steps, so the "parallel"
    # axis actually shards across v7x's 2 TensorCores (no-op on v5e/v6e).
    b16 = _round_up(B, 16)
    if b16 >= 32:
        tm_eff = min(tm, _round_up(max(16, b16 // 2), 16))
    else:
        tm_eff = 16
    grid = (pl.cdiv(B, tm_eff),)

    # Realistic cost hint so XLA overlaps the surrounding slice/cast ops.
    cost = pl.CostEstimate(
        flops=2 * B * F * O_pad,
        transcendentals=0,
        bytes_accessed=(B * F * 4            # x read (f32)
                        + F * O_pad * 2      # W read (bf16)
                        + O_pad * 4          # bias read (f32)
                        + B * O_pad * 2))    # out write (bf16)

    y_pad = pl.pallas_call(
        linear_kernel,
        out_shape=jax.ShapeDtypeStruct((B, O_pad), jnp.bfloat16),
        grid_spec=pltpu.PrefetchScalarGridSpec(
            num_scalar_prefetch=0,
            grid=grid,
            in_specs=[
                pl.BlockSpec((tm_eff, F), lambda i: (i, 0)),   # x: tiled batch
                pl.BlockSpec((F, O_pad), lambda i: (0, 0)),    # W: resident
                pl.BlockSpec((1, O_pad), lambda i: (0, 0)),    # b: resident
            ],
            out_specs=pl.BlockSpec((tm_eff, O_pad), lambda i: (i, 0)),
        ),
        compiler_params=pltpu.CompilerParams(
            dimension_semantics=("parallel",),                 # megacore on v7x
            vmem_limit_bytes=32 * 1024 * 1024),                # safe on v5e/v6e/v7x
        cost_estimate=cost,
    )(x2d, w_bf, b_pad)

    # Strip lane padding and restore the module's f32 output dtype
    # (tiny (B, num_outputs) slice+cast, fused by XLA).
    return y_pad[:, :num_outputs].astype(jnp.float32)


def init_params(key):
    """Deterministic init mimicking nn.Linear's default U(-1/sqrt(fan_in), +)."""
    k_w, k_b = jax.random.split(key)
    bound = 1.0 / (NUM_INPUTS ** 0.5)
    # PyTorch stores weight as (out, in); we keep its transpose (in, out).
    weight_t = jax.random.uniform(
        k_w, (NUM_INPUTS, NUM_OUTPUTS), jnp.float32, -bound, bound)
    bias = jax.random.uniform(
        k_b, (NUM_OUTPUTS,), jnp.float32, -bound, bound)
    return weight_t, bias


if __name__ == "__main__":
    key = jax.random.PRNGKey(0)
    k_x, k_p = jax.random.split(key)

    x = jax.random.normal(k_x, (BATCH, C, H, W), jnp.float32)
    weight_t, bias = init_params(k_p)

    # One-time parameter prep (outside the per-call hot path).
    w_bf, b_pad, num_out = prepare_params(weight_t, bias)

    y = net_forward(x, w_bf, b_pad, num_out)
    y = jax.block_until_ready(y)

    # Sanity check against plain-JAX f32 reference (same math as the PyTorch
    # module).  Loose tolerance accounts for bf16 operands / bf16 writeback
    # (accumulation is f32).
    y_ref = x.reshape(BATCH, NUM_INPUTS) @ weight_t + bias
    assert y.shape == (BATCH, NUM_OUTPUTS)
    assert jnp.allclose(y, y_ref, atol=3e-2, rtol=3e-2), (
        float(jnp.max(jnp.abs(y - y_ref))))

    print("KERNEL_OK")
</pallas_src>

<mosaic_0001>
module attributes {stable_mosaic.version = 11 : i64} {
  func.func @linear_kernel(%arg0: i32, %arg1: memref<16x1024xf32, #tpu.memory_space<vmem>>, %arg2: memref<1024x128xbf16, #tpu.memory_space<vmem>>, %arg3: memref<1x128xf32, #tpu.memory_space<vmem>>, %arg4: memref<16x128xbf16, #tpu.memory_space<vmem>>) attributes {dimension_semantics = [#tpu.dimension_semantics<parallel>], iteration_bounds = array<i64: 1>, scalar_prefetch = 0 : i64, scratch_operands = 0 : i64, tpu.core_type = #tpu.core_type<tc>, window_params = [{transform_indices = @transform_0, window_bounds = array<i64: 16, 1024>}, {pipeline_mode = #tpu.pipeline_mode<synchronous>, transform_indices = @transform_1, window_bounds = array<i64: 1024, 128>}, {pipeline_mode = #tpu.pipeline_mode<synchronous>, transform_indices = @transform_2, window_bounds = array<i64: 1, 128>}, {transform_indices = @transform_3, window_bounds = array<i64: 16, 128>}]} {
    %c0 = arith.constant 0 : index
    %c0_0 = arith.constant 0 : index
    %0 = vector.load %arg1[%c0, %c0_0] : memref<16x1024xf32, #tpu.memory_space<vmem>>, vector<16x1024xf32>
    %1 = arith.truncf %0 : vector<16x1024xf32> to vector<16x1024xbf16>
    %c0_1 = arith.constant 0 : index
    %c0_2 = arith.constant 0 : index
    %2 = vector.load %arg2[%c0_1, %c0_2] : memref<1024x128xbf16, #tpu.memory_space<vmem>>, vector<1024x128xbf16>
    %cst = arith.constant dense<0.000000e+00> : vector<16x128xf32>
    %3 = tpu.matmul %1, %2, %cst {dimension_numbers = #tpu.dot_dimension_numbers<[1], [0], [0], [1], [0, 0, 1, 1], [], []>} : vector<16x1024xbf16>, vector<1024x128xbf16>, vector<16x128xf32> -> vector<16x128xf32>
    %c0_3 = arith.constant 0 : index
    %c0_4 = arith.constant 0 : index
    %4 = vector.load %arg3[%c0_3, %c0_4] : memref<1x128xf32, #tpu.memory_space<vmem>>, vector<1x128xf32>
    %5 = vector.broadcast %4 : vector<1x128xf32> to vector<16x128xf32>
    %6 = arith.addf %3, %5 : vector<16x128xf32>
    %7 = arith.truncf %6 : vector<16x128xf32> to vector<16x128xbf16>
    %c0_5 = arith.constant 0 : index
    %c0_6 = arith.constant 0 : index
    %8 = vector.load %arg4[%c0_5, %c0_6] : memref<16x128xbf16, #tpu.memory_space<vmem>>, vector<16x128xbf16>
    tpu.vector_store %arg4[%c0_5, %c0_6], %7 {strides = array<i32>} : memref<16x128xbf16, #tpu.memory_space<vmem>>, vector<16x128xbf16>,
    return
  }
  func.func @transform_0(%arg0: i32) -> (i32, i32) {
    %c0_i32 = arith.constant 0 : i32
    %c0_i32_0 = arith.constant 0 : i32
    return %arg0, %c0_i32 : i32, i32
  }
  func.func @transform_1(%arg0: i32) -> (i32, i32) {
    %c0_i32 = arith.constant 0 : i32
    %c0_i32_0 = arith.constant 0 : i32
    %c0_i32_1 = arith.constant 0 : i32
    return %c0_i32, %c0_i32_0 : i32, i32
  }
  func.func @transform_2(%arg0: i32) -> (i32, i32) {
    %c0_i32 = arith.constant 0 : i32
    %c0_i32_0 = arith.constant 0 : i32
    %c0_i32_1 = arith.constant 0 : i32
    return %c0_i32, %c0_i32_0 : i32, i32
  }
  func.func @transform_3(%arg0: i32) -> (i32, i32) {
    %c0_i32 = arith.constant 0 : i32
    %c0_i32_0 = arith.constant 0 : i32
    return %arg0, %c0_i32 : i32, i32
  }
}

</mosaic_0001>

<bundles_post_ra>
// kernel: tpu_custom_call.1
= control target key start
LH: loop header
LB: loop body
LE: loop exit
PB: predicated region body
PF: predicated region fallthrough
CT: control target
= control target key end

     0   :  { %8 = vsyncpa [#allocation3], 0  ;;  %s1434_s0 = inlined_call_operand.hbm [shape: f32[2,1024], index: 0, kind: input, shape index: {}]   ;;  %s1435_s1 = inlined_call_operand.hbm [shape: bf16[1024,128], index: 1, kind: input, shape index: {}]   ;;  %s1436_s2 = inlined_call_operand.vmem [shape: f32[1,128], index: 2, kind: input, shape index: {}]   ;;  %s1437_s3 = inlined_call_operand.hbm [shape: bf16[2,128], index: 3, kind: output, shape index: {}]  }
   0x1   :  { %9 = vsyncpa [#allocation6], 0 }
   0x2   :  { %10 = vsyncpa [#allocation4], 0 }
   0x3   :  { %15 = vsyncadd [#allocation3], 1792  ;;  %s1340_s12 = smov [#allocation2]   ;;  %s1268_s16 = scalar_lea.hbm %s1434_s0, 256 }
   0x4   :  { %s16_s13 = sshll.u32 %s1340_s12, 4  ;;  %p1269_p0 = scmp.ne.s32.totalorder %s1434_s0, %s1268_s16  ;;  %s17_s13 = int_to_ptr.vmem [resolvable:$true] %s16_s13 }
   0x5   :  { %p1272_p1 = scmp.lt.u32.totalorder %s1268_s16, %s1434_s0 }
   0x7   :  { %p1274_p2 = pnand %p1272_p1, %p1269_p0 }
   0x9   :  { %1277 = shalt.err (!%p1274_p2)
}
   0xa   :  { %s1278_s21 = scalar_lea.vmem %s17_s13, 256  ;;  %s1282_s22 = scalar_lea.vmem %s17_s13, 2048 }
   0xb   :  { %p1279_p3 = scmp.ne.s32.totalorder %s17_s13, %s1278_s21  ;;  %p1283_p4 = scmp.lt.s32.totalorder %s17_s13, %s17_s13 }
   0xc   :  { %p1284_p5 = scmp.lt.s32.totalorder %s1282_s22, %s1278_s21 }
   0xe   :  { %p1285_p6 = por %p1284_p5, %p1283_p4 }
  0x10   :  { %p1286_p7 = pnand %p1285_p6, %p1279_p3 }
  0x12   :  { %1289 = shalt.err (!%p1286_p7)
}
  0x13   :  { %s1341_s23 = smov 256   ;;  %s1342_s24 = smov 16  }
  0x14   :  { %22 = dma.hbm_to_vmem [thread:$0]  %s1434_s0, 256, %s17_s13, [#allocation3], %s1341_s23, %s1341_s23, %s1342_s24  }
  0x15   :  { %s1343_s27 = smov [#allocation5]   ;;  %s1290_s4 = scalar_lea.hbm %s1435_s1, 8192 }
  0x16   :  { %s28_s28 = sshll.u32 %s1343_s27, 4  ;;  %p1291_p8 = scmp.ne.s32.totalorder %s1435_s1, %s1290_s4  ;;  %s29_s28 = int_to_ptr.vmem [resolvable:$true] %s28_s28 }
  0x17   :  { %p1294_p9 = scmp.lt.u32.totalorder %s1290_s4, %s1435_s1 }
  0x19   :  { %p1296_p10 = pnand %p1294_p9, %p1291_p8 }
  0x1b   :  { %1299 = shalt.err (!%p1296_p10)
}
  0x1c   :  { %s1300_s9 = scalar_lea.vmem %s29_s28, 8192  ;;  %p1305_p12 = scmp.lt.s32.totalorder %s29_s28, %s29_s28 }
  0x1d   :  { %p1301_p11 = scmp.ne.s32.totalorder %s29_s28, %s1300_s9  ;;  %p1306_p13 = scmp.lt.s32.totalorder %s1300_s9, %s1300_s9 }
  0x1f   :  { %p1307_p0 = por %p1306_p13, %p1305_p12 }
  0x21   :  { %p1308_p1 = pnand %p1307_p0, %p1301_p11 }
  0x23   :  { %1311 = shalt.err (!%p1308_p1)
}
  0x24   :  { %s1344_s0 = smov 64   ;;  %s1345_s10 = smov 4  }
  0x25   :  { %34 = dma.hbm_to_vmem [thread:$0]  %s1435_s1, 8192, %s29_s28, [#allocation6], %s1344_s0, %s1344_s0, %s1345_s10  }
  0x26   :  { %1334 = dma.done.wait [#allocation3], 2048  }
  0x27   :  { %1335 = vsyncadd [#allocation3], 4294965248 }
  0x28   :  { %1336 = dma.done.wait [#allocation6], 8192  }
  0x29   :  { %1337 = vsyncadd [#allocation6], 4294959104  ;;  %v1180_v0 = vld [vmem:[#allocation5 + $0x40] sm:$0xff]   ;;  %v1184_v4 = vld [vmem:[#allocation5 + $0x48] sm:$0xff]   ;;  %v1346_v25 = vmov 1983009808   ;;  %v83_v27 = vlaneseq }
  0x2a   :  { %v1181_v1 = vld [vmem:[#allocation5 + $0xc0] sm:$0xff]   ;;  %1082 = vmatprep.subr.bf16.mxu0 %v1180_v0  ;;  %v1185_v5 = vld [vmem:[#allocation5 + $0xc8] sm:$0xff]   ;;  %v1188_v8 = vld [vmem:[#allocation5 + $0x50] sm:$0xff]   ;;  %v81_v26 = vunpack.c.l.s4 %v1346_v25 }
  0x2b   :  { %v1182_v2 = vld [vmem:[#allocation5] sm:$0xff]   ;;  %1104 = vmatprep.subr.bf16.mxu1 %v1181_v1  ;;  %v1186_v6 = vld [vmem:[#allocation5 + $0x8] sm:$0xff]   ;;  %v1189_v9 = vld [vmem:[#allocation5 + $0xd0] sm:$0xff]   ;;  %v1395_v33 = vshrl.u32 %v83_v27, 7 }
  0x2c   :  { %v1183_v3 = vld [vmem:[#allocation5 + $0x80] sm:$0xff]   ;;  %1083 = vmatpush3.bf16.msra.mxu0 %v1182_v2  ;;  %v1187_v7 = vld [vmem:[#allocation5 + $0x88] sm:$0xff]   ;;  %v1190_v10 = vld [vmem:[#allocation5 + $0x10] sm:$0xff]   ;;  %v82_v32 = vunpack.c.0.s8 %v81_v26 }
  0x2d   :  { %1105 = vmatpush3.bf16.msra.mxu1 %v1183_v3  ;;  %1084 = vmatprep.subr.bf16.mxu0 %v1184_v4  ;;  %v1191_v11 = vld [vmem:[#allocation5 + $0x90] sm:$0xff]   ;;  %v1192_v12 = vld [vmem:[#allocation5 + $0x58] sm:$0xff]   ;;  %v1196_v16 = vld [vmem:[#allocation5 + $0x60] sm:$0xff]  }
  0x2e   :  { %1106 = vmatprep.subr.bf16.mxu1 %v1185_v5  ;;  %v1193_v13 = vld [vmem:[#allocation5 + $0xd8] sm:$0xff]   ;;  %v1197_v17 = vld [vmem:[#allocation5 + $0xe0] sm:$0xff]   ;;  %v1200_v20 = vld [vmem:[#allocation5 + $0x68] sm:$0xff]   ;;  %v1398_v37 = vsub.s32 %v82_v32, %v1395_v33 }
  0x2f   :  { %v1194_v14 = vld [vmem:[#allocation5 + $0x18] sm:$0xff]   ;;  %v1198_v18 = vld [vmem:[#allocation5 + $0x20] sm:$0xff]   ;;  %v1201_v21 = vld [vmem:[#allocation5 + $0xe8] sm:$0xff]  }
  0x30   :  { %1085 = vmatpush3.bf16.msra.mxu0 %v1186_v6  ;;  %v1195_v15 = vld [vmem:[#allocation5 + $0x98] sm:$0xff]   ;;  %v1199_v19 = vld [vmem:[#allocation5 + $0xa0] sm:$0xff]   ;;  %v1202_v22 = vld [vmem:[#allocation5 + $0x28] sm:$0xff]  }
  0x31   :  { %1107 = vmatpush3.bf16.msra.mxu1 %v1187_v7  ;;  %1086 = vmatprep.subr.bf16.mxu0 %v1188_v8  ;;  %v1203_v23 = vld [vmem:[#allocation5 + $0xa8] sm:$0xff]   ;;  %v1204_v24 = vld [vmem:[#allocation5 + $0x70] sm:$0xff]   ;;  %v1208_v31 = vld [vmem:[#allocation5 + $0x78] sm:$0xff]  }
  0x32   :  { %1108 = vmatprep.subr.bf16.mxu1 %v1189_v9  ;;  %v1205_v28 = vld [vmem:[#allocation5 + $0xf0] sm:$0xff]   ;;  %v1209_v34 = vld [vmem:[#allocation5 + $0xf8] sm:$0xff]   ;;  %v1224_v53 = vld [vmem:[#allocation5 + $0x140] sm:$0xff]  }
  0x33   :  { %v1206_v29 = vld [vmem:[#allocation5 + $0x30] sm:$0xff]   ;;  %v1210_v35 = vld [vmem:[#allocation5 + $0x38] sm:$0xff]   ;;  %v1225_v58 = vld [vmem:[#allocation5 + $0x1c0] sm:$0xff]  }
  0x34   :  { %1087 = vmatpush3.bf16.msra.mxu0 %v1190_v10  ;;  %v1207_v30 = vld [vmem:[#allocation5 + $0xb0] sm:$0xff]   ;;  %v1211_v36 = vld [vmem:[#allocation5 + $0xb8] sm:$0xff]   ;;  %v1226_v62 = vld [vmem:[#allocation5 + $0x100] sm:$0xff]  }
  0x35   :  { %1109 = vmatpush3.bf16.msra.mxu1 %v1191_v11  ;;  %1088 = vmatprep.subr.bf16.mxu0 %v1192_v12  ;;  %v1212_v38 = vld [vmem:[#allocation2] ss:$16 sps:$4 sm:$0xff]   ;;  %v1220_v43 = vld [vmem:[#allocation2 + $0x4] ss:$16 sps:$4 sm:$0xff]   ;;  %v1228_v4 = vld [vmem:[#allocation5 + $0x148] sm:$0xff]  }
  0x36   :  { %1110 = vmatprep.subr.bf16.mxu1 %v1193_v13  ;;  %v1214_v39 = vld [vmem:[#allocation2 + $0x20] ss:$16 sps:$4 sm:$0xff]   ;;  %v86_v42 = vrot.slane %v1212_v38, %v1398_v37  ;;  %v1221_v44 = vld [vmem:[#allocation2 + $0x24] ss:$16 sps:$4 sm:$0xff]   ;;  %v93_v50 = vrot.slane %v1220_v43, %v1398_v37  ;;  %v1229_v7 = vld [vmem:[#allocation5 + $0x1c8] sm:$0xff]  }
  0x37   :  { %v1216_v40 = vld [vmem:[#allocation2 + $0x40] ss:$16 sps:$4 sm:$0xff]   ;;  %v1222_v45 = vld [vmem:[#allocation2 + $0x44] ss:$16 sps:$4 sm:$0xff]   ;;  %v100_v46 = vrot.slane %v1214_v39, %v1398_v37  ;;  %v107_v51 = vrot.slane %v1221_v44, %v1398_v37  ;;  %v1230_v8 = vld [vmem:[#allocation5 + $0x108] sm:$0xff]  }
  0x38   :  { %1089 = vmatpush3.bf16.msra.mxu0 %v1194_v14  ;;  %v1218_v41 = vld [vmem:[#allocation2 + $0x60] ss:$16 sps:$4 sm:$0xff]   ;;  %v158_v47 = vrot.slane %v1216_v40, %v1398_v37  ;;  %v1223_v49 = vld [vmem:[#allocation2 + $0x64] ss:$16 sps:$4 sm:$0xff]   ;;  %v165_v52 = vrot.slane %v1222_v45, %v1398_v37  ;;  %v1231_v9 = vld [vmem:[#allocation5 + $0x188] sm:$0xff]  }
  0x39   :  { %1111 = vmatpush3.bf16.msra.mxu1 %v1195_v15  ;;  %1090 = vmatprep.subr.bf16.mxu0 %v1196_v16  ;;  %v172_v48 = vrot.slane %v1218_v41, %v1398_v37  ;;  %v109_v54 = vcombine.high %v86_v42, %v100_v46  ;;  %v179_v56 = vrot.slane %v1223_v49, %v1398_v37  ;;  %v1227_v2 = vld [vmem:[#allocation5 + $0x180] sm:$0xff]   ;;  %v1232_v10 = vld [vmem:[#allocation5 + $0x150] sm:$0xff]   ;;  %v1236_v14 = vld [vmem:[#allocation5 + $0x158] sm:$0xff]  }
  0x3a   :  { %1112 = vmatprep.subr.bf16.mxu1 %v1197_v17  ;;  %v108_v57 = vcombine.low %v86_v42, %v100_v46  ;;  %v111_v59 = vcombine.high %v93_v50, %v107_v51  ;;  %v110_v61 = vcombine.low %v93_v50, %v107_v51  ;;  %v1233_v11 = vld [vmem:[#allocation5 + $0x1d0] sm:$0xff]   ;;  %v1237_v15 = vld [vmem:[#allocation5 + $0x1d8] sm:$0xff]   ;;  %v1247_v25 = vld [vmem:[#allocation5 + $0x1a8] sm:$0xff]  }
  0x3b   :  { %v181_v55 = vcombine.high %v158_v47, %v172_v48  ;;  %v180_v60 = vcombine.low %v158_v47, %v172_v48  ;;  %v183_v0 = vcombine.high %v165_v52, %v179_v56  ;;  %v182_v1 = vcombine.low %v165_v52, %v179_v56  ;;  %v1234_v12 = vld [vmem:[#allocation5 + $0x110] sm:$0xff]   ;;  %v1238_v16 = vld [vmem:[#allocation5 + $0x118] sm:$0xff]  }
  0x3c   :  { %1091 = vmatpush3.bf16.msra.mxu0 %v1198_v18  ;;  %v1235_v13 = vld [vmem:[#allocation5 + $0x190] sm:$0xff]   ;;  %v1239_v17 = vld [vmem:[#allocation5 + $0x198] sm:$0xff]   ;;  %v1240_v18 = vld [vmem:[#allocation5 + $0x160] sm:$0xff]  }
  0x3d   :  { %1113 = vmatpush3.bf16.msra.mxu1 %v1199_v19  ;;  %1092 = vmatprep.subr.bf16.mxu0 %v1200_v20  ;;  %v237_v63 = vpack.c.bf16 %v181_v55, %v109_v54  ;;  %v236_v3 = vpack.c.bf16 %v180_v60, %v108_v57  ;;  %v239_v5 = vpack.c.bf16 %v183_v0, %v111_v59  ;;  %v1241_v19 = vld [vmem:[#allocation5 + $0x1e0] sm:$0xff]   ;;  %v1248_v26 = vld [vmem:[#allocation5 + $0x170] sm:$0xff]   ;;  %v1254_v32 = vld [vmem:[#allocation5 + $0x138] sm:$0xff]  }
  0x3e   :  { %1114 = vmatprep.subr.bf16.mxu1 %v1201_v21  ;;  %v238_v6 = vpack.c.bf16 %v182_v1, %v110_v61  ;;  %v1242_v20 = vld [vmem:[#allocation5 + $0x120] sm:$0xff]   ;;  %v1249_v27 = vld [vmem:[#allocation5 + $0x1f0] sm:$0xff]   ;;  %v1260_v38 = vld [vmem:[#allocation2 + $0x48] ss:$16 sps:$4 sm:$0xff]  }
  0x3f   :  { %795 = vmatprep.mubr.bf16.mxu0 %v237_v63  ;;  %836 = vmatprep.mubr.bf16.mxu1 %v239_v5  ;;  %v1243_v21 = vld [vmem:[#allocation5 + $0x1a0] sm:$0xff]   ;;  %v1262_v39 = vld [vmem:[#allocation2 + $0x68] ss:$16 sps:$4 sm:$0xff]   ;;  %v1264_v40 = vld [vmem:[#allocation2 + $0xc] ss:$16 sps:$4 sm:$0xff]   ;;  %v194_v44 = vrot.slane %v1260_v38, %v1398_v37 }
  0x40   :  { %1093 = vmatpush3.bf16.msra.mxu0 %v1202_v22  ;;  %v1244_v22 = vld [vmem:[#allocation5 + $0x168] sm:$0xff]   ;;  %v208_v47 = vrot.slane %v1262_v39, %v1398_v37  ;;  %v129_v48 = vrot.slane %v1264_v40, %v1398_v37 }
  0x41   :  { %1115 = vmatpush3.bf16.msra.mxu1 %v1203_v23  ;;  %1094 = vmatprep.subr.bf16.mxu0 %v1204_v24  ;;  %v1245_v23 = vld [vmem:[#allocation5 + $0x1e8] sm:$0xff]  }
  0x42   :  { %1116 = vmatprep.subr.bf16.mxu1 %v1205_v28  ;;  %v1246_v24 = vld [vmem:[#allocation5 + $0x128] sm:$0xff]   ;;  %v1250_v28 = vld [vmem:[#allocation5 + $0x130] sm:$0xff]   ;;  %v217_v54 = vcombine.high %v194_v44, %v208_v47  ;;  %v216_v56 = vcombine.low %v194_v44, %v208_v47 }
  0x43   :  { %v1265_v41 = vld [vmem:[#allocation2 + $0x2c] ss:$16 sps:$4 sm:$0xff]  }
  0x44   :  { %1095 = vmatpush3.bf16.msra.mxu0 %v1206_v29  ;;  %v1251_v29 = vld [vmem:[#allocation5 + $0x1b0] sm:$0xff]   ;;  %v1266_v45 = vld [vmem:[#allocation2 + $0x4c] ss:$16 sps:$4 sm:$0xff]   ;;  %v143_v49 = vrot.slane %v1265_v41, %v1398_v37 }
  0x45   :  { %1117 = vmatpush3.bf16.msra.mxu1 %v1207_v30  ;;  %1096 = vmatprep.subr.bf16.mxu0 %v1208_v31  ;;  %v1252_v30 = vld [vmem:[#allocation5 + $0x178] sm:$0xff]   ;;  %v201_v51 = vrot.slane %v1266_v45, %v1398_v37 }
  0x46   :  { %1118 = vmatprep.subr.bf16.mxu1 %v1209_v34  ;;  %v1253_v31 = vld [vmem:[#allocation5 + $0x1f8] sm:$0xff]   ;;  %v147_v55 = vcombine.high %v129_v48, %v143_v49  ;;  %v146_v57 = vcombine.low %v129_v48, %v143_v49 }
  0x47   :  { %v1255_v34 = vld [vmem:[#allocation5 + $0x1b8] sm:$0xff]  }
  0x48   :  { %1097 = vmatpush3.bf16.msra.mxu0 %v1210_v35  ;;  %v1256_v35 = vld [vmem:[#allocation2 + $0x8] ss:$16 sps:$4 sm:$0xff]   ;;  %v1267_v46 = vld [vmem:[#allocation2 + $0x6c] ss:$16 sps:$4 sm:$0xff]  }
  0x49   :  { %1119 = vmatpush3.bf16.msra.mxu1 %v1211_v36  ;;  %1126 = vmatprep.subr.bf16.mxu0 %v1224_v53  ;;  %v1258_v36 = vld [vmem:[#allocation2 + $0x28] ss:$16 sps:$4 sm:$0xff]   ;;  %v122_v42 = vrot.slane %v1256_v35, %v1398_v37  ;;  %v215_v52 = vrot.slane %v1267_v46, %v1398_v37 }
  0x4a   :  { %1148 = vmatprep.subr.bf16.mxu1 %v1225_v58  ;;  %v136_v43 = vrot.slane %v1258_v36, %v1398_v37  ;;  %v1012_v37 = vld [vmem:[%s1436_s2] ss:$0 sm:$0xff] }
  0x4b   :  { %796 = vmatmul.mubr.bf16.vlgmr.msra.gmra.mrb[0].mxu0 %v236_v3  ;;  %v219_v58 = vcombine.high %v201_v51, %v215_v52  ;;  %v218_v59 = vcombine.low %v201_v51, %v215_v52 }
  0x4c   :  { %1127 = vmatpush3.bf16.msra.mxu0 %v1226_v62  ;;  %837 = vmatmul.mubr.bf16.vlgmr.msra.gmra.mrb[0].mxu1 %v238_v6  ;;  %v145_v50 = vcombine.high %v122_v42, %v136_v43  ;;  %v144_v53 = vcombine.low %v122_v42, %v136_v43 }
  0x4d   :  { %1128 = vmatprep.subr.bf16.mxu0 %v1228_v4  ;;  %1149 = vmatpush3.bf16.msra.mxu1 %v1227_v2  ;;  %v243_v62 = vpack.c.bf16 %v219_v58, %v147_v55  ;;  %v242_v63 = vpack.c.bf16 %v218_v59, %v146_v57 }
  0x4e   :  { %1150 = vmatprep.subr.bf16.mxu1 %v1229_v7  ;;  %v241_v60 = vpack.c.bf16 %v217_v54, %v145_v50  ;;  %v240_v61 = vpack.c.bf16 %v216_v56, %v144_v53 }
  0x4f   :  { %918 = vmatprep.mubr.bf16.mxu1 %v243_v62 }
  0x50   :  { %1129 = vmatpush3.bf16.msra.mxu0 %v1230_v8  ;;  %877 = vmatprep.mubr.bf16.mxu0 %v241_v60 }
  0x51   :  { %1130 = vmatprep.subr.bf16.mxu0 %v1232_v10  ;;  %1151 = vmatpush3.bf16.msra.mxu1 %v1231_v9 }
  0x52   :  { %1152 = vmatprep.subr.bf16.mxu1 %v1233_v11 }
  0x54   :  { %1131 = vmatpush3.bf16.msra.mxu0 %v1234_v12 }
  0x55   :  { %1132 = vmatprep.subr.bf16.mxu0 %v1236_v14  ;;  %1153 = vmatpush3.bf16.msra.mxu1 %v1235_v13 }
  0x56   :  { %1154 = vmatprep.subr.bf16.mxu1 %v1237_v15 }
  0x58   :  { %1133 = vmatpush3.bf16.msra.mxu0 %v1238_v16 }
  0x59   :  { %1134 = vmatprep.subr.bf16.mxu0 %v1240_v18  ;;  %1155 = vmatpush3.bf16.msra.mxu1 %v1239_v17  ;;  %v1347_v17 = vmov 1966171168  }
  0x5a   :  { %1156 = vmatprep.subr.bf16.mxu1 %v1241_v19  ;;  %v931_v18 = vunpack.c.l.s4 %v1347_v17 }
  0x5c   :  { %1135 = vmatpush3.bf16.msra.mxu0 %v1242_v20 }
  0x5d   :  { %1136 = vmatprep.subr.bf16.mxu0 %v1244_v22  ;;  %1157 = vmatpush3.bf16.msra.mxu1 %v1243_v21 }
  0x5e   :  { %1158 = vmatprep.subr.bf16.mxu1 %v1245_v23 }
  0x60   :  { %1137 = vmatpush3.bf16.msra.mxu0 %v1246_v24 }
  0x61   :  { %1138 = vmatprep.subr.bf16.mxu0 %v1248_v26  ;;  %1159 = vmatpush3.bf16.msra.mxu1 %v1247_v25 }
  0x62   :  { %1160 = vmatprep.subr.bf16.mxu1 %v1249_v27 }
  0x64   :  { %1139 = vmatpush3.bf16.msra.mxu0 %v1250_v28 }
  0x65   :  { %1140 = vmatprep.subr.bf16.mxu0 %v1252_v30  ;;  %1161 = vmatpush3.bf16.msra.mxu1 %v1251_v29  ;;  %v932_v30 = vunpack.c.0.s8 %v931_v18 }
  0x66   :  { %1162 = vmatprep.subr.bf16.mxu1 %v1253_v31 }
  0x67   :  { %v935_v36 = vsub.s32 %v932_v30, %v1395_v33 }
  0x68   :  { %1141 = vmatpush3.bf16.msra.mxu0 %v1254_v32 }
  0x69   :  { %1163 = vmatpush3.bf16.msra.mxu1 %v1255_v34 }
  0x6b   :  { %878 = vmatmul.mubr.bf16.vlgmr.msra.gmra.mrb[4].mxu0 %v240_v61 }
  0x6c   :  { %919 = vmatmul.mubr.bf16.vlgmr.msra.gmra.mrb[4].mxu1 %v242_v63 }
 0x11e   :  { %v1098_v0 = vpop.f32.mrb[0].mxu0 }
 0x11f   :  { %v1099_v1 = vpop.f32.mrb[1].mxu0  ;;  %v1120_v2 = vpop.f32.mrb[0].mxu1 }
 0x120   :  { %v1100_v3 = vadd.f32 %v1099_v1, %v1098_v0  ;;  %v1101_v4 = vpop.f32.mrb[2].mxu0  ;;  %v1121_v5 = vpop.f32.mrb[1].mxu1 }
 0x121   :  { %v1102_v6 = vpop.f32.mrb[3].mxu0  ;;  %v1122_v8 = vadd.f32 %v1121_v5, %v1120_v2  ;;  %v1123_v9 = vpop.f32.mrb[2].mxu1 }
 0x122   :  { %v798_v7 = vadd.f32 %v1100_v3, %v1012_v37  ;;  %v1103_v10 = vadd.f32 %v1102_v6, %v1101_v4  ;;  %v1124_v11 = vpop.f32.mrb[3].mxu1 }
 0x123   :  { %v1125_v14 = vadd.f32 %v1124_v11, %v1123_v9 }
 0x124   :  { %v839_v12 = vadd.f32 %v1122_v8, %v798_v7  ;;  %v801_v13 = vadd.f32 %v1103_v10, %v1012_v37 }
 0x126   :  { %v842_v15 = vadd.f32 %v1125_v14, %v801_v13 }
 0x13e   :  { %v1142_v16 = vpop.f32.mrb[4].mxu0 }
 0x13f   :  { %v1164_v19 = vpop.f32.mrb[4].mxu1  ;;  %v1143_v20 = vpop.f32.mrb[5].mxu0 }
 0x140   :  { %v1144_v21 = vadd.f32 %v1143_v20, %v1142_v16  ;;  %v1165_v22 = vpop.f32.mrb[5].mxu1  ;;  %v1145_v23 = vpop.f32.mrb[6].mxu0 }
 0x141   :  { %v1166_v24 = vadd.f32 %v1165_v22, %v1164_v19  ;;  %v1167_v25 = vpop.f32.mrb[6].mxu1  ;;  %v1146_v26 = vpop.f32.mrb[7].mxu0 }
 0x142   :  { %v880_v27 = vadd.f32 %v1144_v21, %v839_v12  ;;  %v1147_v28 = vadd.f32 %v1146_v26, %v1145_v23  ;;  %v1168_v29 = vpop.f32.mrb[7].mxu1 }
 0x143   :  { %v1169_v31 = vadd.f32 %v1168_v29, %v1167_v25 }
 0x144   :  { %v921_v32 = vadd.f32 %v1166_v24, %v880_v27  ;;  %v883_v34 = vadd.f32 %v1147_v28, %v842_v15 }
 0x146   :  { %v924_v35 = vadd.f32 %v1169_v31, %v883_v34 }
 0x148   :  { %v927_v38 = vpack.c.bf16 %v924_v35, %v921_v32  ;;  %v1077_v39 = vpack.c.bf16 %v924_v35, %v924_v35 }
 0x14a   :  { %v936_v40 = vrot.slane %v927_v38, %v935_v36  ;;  %v943_v41 = vrot.slane %v1077_v39, %v935_v36 }
 0x14c   :  { %v944_v42 = vcombine.high %v936_v40, %v936_v40  ;;  %v945_v43 = vcombine.high %v943_v41, %v943_v41  ;;  %v952_v44 = vrot.slane %v936_v40, %v935_v36  ;;  %v959_v45 = vrot.slane %v943_v41, %v935_v36  ;;  %1078 = vst.sshfl [vmem:[#allocation7] sm:$0x1 pattern:$0x73625140] %v936_v40 }
 0x14d   :  { %1080 = vst.sshfl [vmem:[#allocation7 + $0x4] sm:$0x1 pattern:$0x73625140] %v943_v41 }
 0x14e   :  { %v966_v46 = vrot.slane %v944_v42, %v935_v36  ;;  %v973_v47 = vrot.slane %v945_v43, %v935_v36  ;;  %v974_v48 = vcombine.high %v952_v44, %v952_v44  ;;  %v975_v49 = vcombine.high %v959_v45, %v959_v45  ;;  %1079 = vst.sshfl [vmem:[#allocation7 + $0x1] sm:$0x1 pattern:$0x73625140] %v944_v42 }
 0x14f   :  { %1081 = vst.sshfl [vmem:[#allocation7 + $0x5] sm:$0x1 pattern:$0x73625140] %v945_v43 }
 0x150   :  { %v976_v50 = vcombine.high %v966_v46, %v966_v46  ;;  %v977_v51 = vcombine.high %v973_v47, %v973_v47  ;;  %988 = vst [vmem:[#allocation7 + $0x2] sm:$0x1] %v974_v48  ;;  %992 = vst [vmem:[#allocation7 + $0x6] sm:$0x1] %v975_v49 }
 0x152   :  { %989 = vst [vmem:[#allocation7 + $0x3] sm:$0x1] %v976_v50  ;;  %993 = vst [vmem:[#allocation7 + $0x7] sm:$0x1] %v977_v51 }
 0x153   :  { %998 = vsyncadd [#allocation4], 112  ;;  %s1348_s2 = smov [#allocation7]  }
 0x154   :  { %s999_s14 = sshll.u32 %s1348_s2, 4  ;;  %s1000_s14 = int_to_ptr.vmem [resolvable:$true] %s999_s14 }
 0x155   :  { %s1312_s15 = scalar_lea.vmem %s1000_s14, 16  ;;  %s1316_s16 = scalar_lea.vmem %s1000_s14, 128 }
 0x156   :  { %p1313_p2 = scmp.ne.s32.totalorder %s1000_s14, %s1312_s15  ;;  %p1317_p3 = scmp.lt.s32.totalorder %s1000_s14, %s1000_s14 }
 0x157   :  { %p1318_p4 = scmp.lt.s32.totalorder %s1316_s16, %s1312_s15 }
 0x159   :  { %p1319_p5 = por %p1318_p4, %p1317_p3 }
 0x15b   :  { %p1320_p6 = pnand %p1319_p5, %p1313_p2 }
 0x15d   :  { %1323 = shalt.err (!%p1320_p6)
}
 0x15e   :  { %s1324_s19 = scalar_lea.hbm %s1437_s3, 16 }
 0x15f   :  { %p1325_p7 = scmp.ne.s32.totalorder %s1437_s3, %s1324_s19  ;;  %p1328_p8 = scmp.lt.u32.totalorder %s1324_s19, %s1437_s3 }
 0x161   :  { %p1330_p9 = pnand %p1328_p8, %p1325_p7 }
 0x163   :  { %1333 = shalt.err (!%p1330_p9)
}
 0x164   :  { %s1349_s25 = smov 1  }
 0x165   :  { %1005 = dma.vmem_to_hbm [thread:$0]  %s1000_s14, 16, %s1437_s3, [#allocation4], %s1342_s24, %s1342_s24, %s1349_s25  }
 0x166   :  { %1338 = dma.done.wait [#allocation4], 128  }
 0x167   :  { %1339 = vsyncadd [#allocation4], 4294967168 }
 0x168   :  { %1009 = vsyncpa [#allocation3], 1 }
 0x169   :  { %1010 = vsyncpa [#allocation6], 1 }
 0x16a   :  { %1011 = vsyncpa [#allocation4], 1 }

</bundles_post_ra>
